<compile_context>
chip_gen: v6e
topology: v6e:2x2x1
jax: 0.10.0
libtpu: 0.0.40
codegen_flags: <defaults>
</compile_context>

<pallas_src>
import functools

import jax
import jax.numpy as jnp
from jax.experimental import pallas as pl
from jax.experimental.pallas import tpu as pltpu

OBS_SPACE = 4
HIDDEN_SIZE = 128
ACTION_SPACE = 2
DROP_RATE = 0.2  # unused at inference (eval-mode identity)


def mlp_kernel(xt_ref, w1_ref, b1_ref, w2_ref, b2_ref, ot_ref):
    # Cast x to the matmul dtype in-kernel (VPU, non-binding) -- avoids an
    # extra host-side HBM pass over x just to change dtype.
    xt = xt_ref[...].astype(w1_ref.dtype)                  # (OBS, tb)

    # fc_1 on the MXU, f32 accumulation.  K=4 is small but streamed over a
    # lane-dense tb it amortizes; the MXU is otherwise idle.
    h = jnp.dot(w1_ref[...], xt, preferred_element_type=jnp.float32)  # (HIDDEN, tb)
    # bias + ReLU on the VPU: 2 ops per element, below the binding slot.
    h = jnp.maximum(h + b1_ref[...], 0.0)

    # drop_1: identity at inference time (module.eval()).

    # fc_2 on the MXU; feed h in the weight dtype (bf16 halves its VMEM
    # round trip and is MXU-native).  Batch stays on the lane axis ->
    # lane-dense, unmasked output store.
    out = jnp.dot(w2_ref[...], h.astype(w2_ref.dtype),
                  preferred_element_type=jnp.float32)       # (ACTION, tb)
    ot_ref[...] = (out + b2_ref[...]).astype(ot_ref.dtype)


def _round_up(n, m):
    return ((n + m - 1) // m) * m


def _choose_tile(batch, block_b):
    # Keep the output store unmasked: lane tile must be a multiple of 128.
    block_b = max(128, _round_up(int(block_b), 128))
    b128 = _round_up(batch, 128)
    tb = min(block_b, b128)
    # For mid/large batches guarantee >= 2 grid steps so the "parallel" axis
    # can shard across v7x's two TensorCores (no effect on v5e/v6e single TC).
    if b128 >= 2048 and tb >= b128:
        tb = _round_up((b128 + 1) // 2, 128)
    b_pad = _round_up(batch, tb)
    return tb, b_pad


@functools.partial(jax.jit, static_argnames=("block_b", "use_bf16"))
def mlp_forward_t(xt, w1, b1, w2, b2, *, block_b=8192, use_bf16=True):
    """Preferred entry point: (feature, batch) layout end-to-end, no host
    transposes.

    xt : (OBS_SPACE, B) f32 -- batch on the lane axis.
    Weights in PyTorch nn.Linear layout: w1 (HIDDEN, OBS), b1 (HIDDEN,),
    w2 (ACTION, HIDDEN), b2 (ACTION,).
    Returns (ACTION_SPACE, B) f32.
    """
    B = xt.shape[1]
    tb, b_pad = _choose_tile(B, block_b)
    if b_pad != B:
        xt = jnp.pad(xt, ((0, 0), (0, b_pad - B)))

    mxu_dtype = jnp.bfloat16 if use_bf16 else jnp.float32
    w1_c = w1.astype(mxu_dtype)                       # (HIDDEN, OBS), ~1 KB
    w2_c = w2.astype(mxu_dtype)                       # (ACTION, HIDDEN), ~0.5 KB
    b1_c = b1.reshape(HIDDEN_SIZE, 1).astype(jnp.float32)
    b2_c = b2.reshape(ACTION_SPACE, 1).astype(jnp.float32)

    out_t = pl.pallas_call(
        mlp_kernel,
        out_shape=jax.ShapeDtypeStruct((ACTION_SPACE, b_pad), jnp.float32),
        grid=(b_pad // tb,),
        in_specs=[
            pl.BlockSpec((OBS_SPACE, tb), lambda i: (0, i)),              # xT tile
            pl.BlockSpec((HIDDEN_SIZE, OBS_SPACE), lambda i: (0, 0)),     # w1 (VMEM-resident)
            pl.BlockSpec((HIDDEN_SIZE, 1), lambda i: (0, 0)),             # b1 (resident)
            pl.BlockSpec((ACTION_SPACE, HIDDEN_SIZE), lambda i: (0, 0)),  # w2 (resident)
            pl.BlockSpec((ACTION_SPACE, 1), lambda i: (0, 0)),            # b2 (resident)
        ],
        out_specs=pl.BlockSpec((ACTION_SPACE, tb), lambda i: (0, i)),
        compiler_params=pltpu.CompilerParams(
            # Independent batch tiles: sharded over v7x's 2 TensorCores.
            dimension_semantics=("parallel",),
            # Worst-case per-step footprint at tb=8192 (f32 h + bf16 h + I/O
            # double buffers) is < 8 MiB; 32 MiB keeps headroom on v7x's
            # 64 MiB/TC VMEM and is safe on v5e/v6e (128 MiB).
            vmem_limit_bytes=32 * 1024 * 1024,
        ),
    )(xt, w1_c, b1_c, w2_c, b2_c)

    return out_t[:, :B]


@functools.partial(jax.jit, static_argnames=("block_b", "use_bf16"))
def mlp_forward(x, w1, b1, w2, b2, *, block_b=8192, use_bf16=True):
    """PyTorch-interface wrapper: x (B, OBS_SPACE) -> (B, ACTION_SPACE).

    Pays two standalone host-side transpose passes over x / out for interface
    compatibility; pipelines that can keep the (feature, batch) layout should
    call mlp_forward_t directly and skip them.
    """
    out_t = mlp_forward_t(x.T, w1, b1, w2, b2, block_b=block_b, use_bf16=use_bf16)
    return out_t.T


def init_params(key):
    """Deterministic init mimicking nn.Linear default (U[-1/sqrt(fan_in), +]),
    stored in PyTorch-native (out_features, in_features) layout."""
    k1, k2, k3, k4 = jax.random.split(key, 4)
    bound1 = 1.0 / (OBS_SPACE ** 0.5)
    bound2 = 1.0 / (HIDDEN_SIZE ** 0.5)
    w1 = jax.random.uniform(k1, (HIDDEN_SIZE, OBS_SPACE), jnp.float32, -bound1, bound1)
    b1 = jax.random.uniform(k2, (HIDDEN_SIZE,), jnp.float32, -bound1, bound1)
    w2 = jax.random.uniform(k3, (ACTION_SPACE, HIDDEN_SIZE), jnp.float32, -bound2, bound2)
    b2 = jax.random.uniform(k4, (ACTION_SPACE,), jnp.float32, -bound2, bound2)
    return w1, b1, w2, b2


if __name__ == "__main__":
    key = jax.random.PRNGKey(0)
    k_params, k_x = jax.random.split(key)
    w1, b1, w2, b2 = init_params(k_params)

    def ref_fn(x):
        # Eval-mode reference: fc_2(relu(fc_1(x))); dropout is identity.
        h = jnp.maximum(x @ w1.T + b1, 0.0)
        return h @ w2.T + b2

    # Small per-step batch (grid of 1) and a padded multi-tile batch (grid of 3).
    for B, blk in ((8, 8192), (300, 128)):
        x = jax.random.normal(jax.random.fold_in(k_x, B), (B, OBS_SPACE), jnp.float32)
        ref = ref_fn(x)

        # Full-f32 MXU path: tight tolerance.
        out32 = jax.block_until_ready(
            mlp_forward(x, w1, b1, w2, b2, block_b=blk, use_bf16=False))
        assert out32.shape == (B, ACTION_SPACE)
        assert jnp.allclose(out32, ref, atol=1e-4, rtol=1e-4), (
            float(jnp.max(jnp.abs(out32 - ref))))

        # Default bf16-operand path (MXU-native): looser tolerance.
        out16 = jax.block_until_ready(
            mlp_forward(x, w1, b1, w2, b2, block_b=blk, use_bf16=True))
        assert out16.shape == (B, ACTION_SPACE)
        assert jnp.allclose(out16, ref, atol=5e-2, rtol=5e-2), (
            float(jnp.max(jnp.abs(out16 - ref))))

    print("KERNEL_OK")
</pallas_src>

<mosaic_0001>
module attributes {stable_mosaic.version = 11 : i64} {
  func.func @mlp_kernel(%arg0: i32, %arg1: memref<4x128xf32, #tpu.memory_space<vmem>>, %arg2: memref<128x4xf32, #tpu.memory_space<vmem>>, %arg3: memref<128x1xf32, #tpu.memory_space<vmem>>, %arg4: memref<2x128xf32, #tpu.memory_space<vmem>>, %arg5: memref<2x1xf32, #tpu.memory_space<vmem>>, %arg6: memref<2x128xf32, #tpu.memory_space<vmem>>) attributes {dimension_semantics = [#tpu.dimension_semantics<parallel>], iteration_bounds = array<i64: 1>, scalar_prefetch = 0 : i64, scratch_operands = 0 : i64, tpu.core_type = #tpu.core_type<tc>, window_params = [{transform_indices = @transform_0, window_bounds = array<i64: 4, 128>}, {pipeline_mode = #tpu.pipeline_mode<synchronous>, transform_indices = @transform_1, window_bounds = array<i64: 128, 4>}, {pipeline_mode = #tpu.pipeline_mode<synchronous>, transform_indices = @transform_2, window_bounds = array<i64: 128, 1>}, {pipeline_mode = #tpu.pipeline_mode<synchronous>, transform_indices = @transform_3, window_bounds = array<i64: 2, 128>}, {pipeline_mode = #tpu.pipeline_mode<synchronous>, transform_indices = @transform_4, window_bounds = array<i64: 2, 1>}, {transform_indices = @transform_5, window_bounds = array<i64: 2, 128>}]} {
    %c0 = arith.constant 0 : index
    %c0_0 = arith.constant 0 : index
    %0 = vector.load %arg1[%c0, %c0_0] : memref<4x128xf32, #tpu.memory_space<vmem>>, vector<4x128xf32>
    %c0_1 = arith.constant 0 : index
    %c0_2 = arith.constant 0 : index
    %1 = vector.load %arg2[%c0_1, %c0_2] : memref<128x4xf32, #tpu.memory_space<vmem>>, vector<128x4xf32>
    %cst = arith.constant dense<0.000000e+00> : vector<128x128xf32>
    %2 = tpu.matmul %1, %0, %cst {dimension_numbers = #tpu.dot_dimension_numbers<[1], [0], [0], [1], [0, 0, 1, 1], [], []>} : vector<128x4xf32>, vector<4x128xf32>, vector<128x128xf32> -> vector<128x128xf32>
    %c0_3 = arith.constant 0 : index
    %c0_4 = arith.constant 0 : index
    %3 = vector.load %arg3[%c0_3, %c0_4] : memref<128x1xf32, #tpu.memory_space<vmem>>, vector<128x1xf32>
    %4 = vector.broadcast %3 : vector<128x1xf32> to vector<128x128xf32>
    %5 = arith.addf %2, %4 : vector<128x128xf32>
    %cst_5 = arith.constant 0.000000e+00 : f32
    %6 = vector.broadcast %cst_5 : f32 to vector<128x128xf32>
    %7 = arith.maximumf %5, %6 : vector<128x128xf32>
    %c0_6 = arith.constant 0 : index
    %c0_7 = arith.constant 0 : index
    %8 = vector.load %arg4[%c0_6, %c0_7] : memref<2x128xf32, #tpu.memory_space<vmem>>, vector<2x128xf32>
    %cst_8 = arith.constant dense<0.000000e+00> : vector<2x128xf32>
    %9 = tpu.matmul %8, %7, %cst_8 {dimension_numbers = #tpu.dot_dimension_numbers<[1], [0], [0], [1], [0, 0, 1, 1], [], []>} : vector<2x128xf32>, vector<128x128xf32>, vector<2x128xf32> -> vector<2x128xf32>
    %c0_9 = arith.constant 0 : index
    %c0_10 = arith.constant 0 : index
    %10 = vector.load %arg5[%c0_9, %c0_10] : memref<2x1xf32, #tpu.memory_space<vmem>>, vector<2x1xf32>
    %11 = vector.broadcast %10 : vector<2x1xf32> to vector<2x128xf32>
    %12 = arith.addf %9, %11 : vector<2x128xf32>
    %c0_11 = arith.constant 0 : index
    %c0_12 = arith.constant 0 : index
    %13 = vector.load %arg6[%c0_11, %c0_12] : memref<2x128xf32, #tpu.memory_space<vmem>>, vector<2x128xf32>
    tpu.vector_store %arg6[%c0_11, %c0_12], %12 {strides = array<i32>} : memref<2x128xf32, #tpu.memory_space<vmem>>, vector<2x128xf32>,
    return
  }
  func.func @transform_0(%arg0: i32) -> (i32, i32) {
    %c0_i32 = arith.constant 0 : i32
    %c0_i32_0 = arith.constant 0 : i32
    return %c0_i32, %arg0 : i32, i32
  }
  func.func @transform_1(%arg0: i32) -> (i32, i32) {
    %c0_i32 = arith.constant 0 : i32
    %c0_i32_0 = arith.constant 0 : i32
    %c0_i32_1 = arith.constant 0 : i32
    return %c0_i32, %c0_i32_0 : i32, i32
  }
  func.func @transform_2(%arg0: i32) -> (i32, i32) {
    %c0_i32 = arith.constant 0 : i32
    %c0_i32_0 = arith.constant 0 : i32
    %c0_i32_1 = arith.constant 0 : i32
    return %c0_i32, %c0_i32_0 : i32, i32
  }
  func.func @transform_3(%arg0: i32) -> (i32, i32) {
    %c0_i32 = arith.constant 0 : i32
    %c0_i32_0 = arith.constant 0 : i32
    %c0_i32_1 = arith.constant 0 : i32
    return %c0_i32, %c0_i32_0 : i32, i32
  }
  func.func @transform_4(%arg0: i32) -> (i32, i32) {
    %c0_i32 = arith.constant 0 : i32
    %c0_i32_0 = arith.constant 0 : i32
    %c0_i32_1 = arith.constant 0 : i32
    return %c0_i32, %c0_i32_0 : i32, i32
  }
  func.func @transform_5(%arg0: i32) -> (i32, i32) {
    %c0_i32 = arith.constant 0 : i32
    %c0_i32_0 = arith.constant 0 : i32
    return %c0_i32, %arg0 : i32, i32
  }
}

</mosaic_0001>

<bundles_post_ra>
// kernel: mlp_forward_t.1
= control target key start
LH: loop header
LB: loop body
LE: loop exit
PB: predicated region body
PF: predicated region fallthrough
CT: control target
= control target key end

     0   :  { %vm183_vm0 = vcmask 1043456   ;;  %vm134_vm1 = vcmask 31744   ;;  %v580_v4 = vmov 0   ;;  %s767_s0 = inlined_call_operand.vmem [shape: f32[4,128], index: 0, kind: input, shape index: {}]   ;;  %s768_s1 = inlined_call_operand.vmem [shape: f32[128,4], index: 1, kind: input, shape index: {}]   ;;  %s769_s2 = inlined_call_operand.vmem [shape: f32[128,1], index: 2, kind: input, shape index: {}]   ;;  %s770_s3 = inlined_call_operand.vmem [shape: f32[2,128], index: 3, kind: input, shape index: {}]   ;;  %s771_s4 = inlined_call_operand.vmem [shape: f32[2,1], index: 4, kind: input, shape index: {}]   ;;  %s772_s5 = inlined_call_operand.hbm [shape: f32[2,128], index: 5, kind: output, shape index: {}]  }
   0x1   :  { %v21_v0 = vld [vmem:[%s767_s0] sm:$0xf]  ;;  %v23_v2 = vld [vmem:[%s768_s1 + $0x8] sm:$0xff]  ;;  %v24_v3 = vld [vmem:[%s768_s1 + $0x10] sm:$0xff]  ;;  %556 = vset.pattern.permute.xlu0 %v580_v4  ;;  %557 = vset.pattern.permute.xlu1 %v580_v4 }
   0x2   :  { %v22_v1 = vld [vmem:[%s768_s1] sm:$0xff]  ;;  %491 = vmatprep.subr.msk.mxu0 %vm183_vm0, %v21_v0  ;;  %v25_v5 = vld [vmem:[%s768_s1 + $0x18] sm:$0xff]  ;;  %v51_v8 = vld [vmem:[%s769_s2 + $0x68] sm:$0xff] }
   0x3   :  { %493 = vmatprep.mubr.msk.f32.mxu0 %vm134_vm1, %v22_v1  ;;  %492 = vmatpush3.msk.msra.mxu0 %vm183_vm0, %v21_v0  ;;  %v26_v6 = vld [vmem:[%s768_s1 + $0x20] sm:$0xff]  ;;  %v53_v7 = vld [vmem:[%s769_s2 + $0x78] sm:$0xff]  ;;  %v52_v9 = vld [vmem:[%s769_s2 + $0x70] sm:$0xff] }
   0x4   :  { %494 = vmatmul.mubr.msk.f32.vlgmr.msra.gmra.mxu0 %vm134_vm1, %v23_v2  ;;  %131 = vperm.xlu0 %556, %v53_v7   ;;  %v27_v10 = vld [vmem:[%s768_s1 + $0x28] sm:$0xff]  ;;  %v50_v11 = vld [vmem:[%s769_s2 + $0x60] sm:$0xff]  ;;  %v28_v12 = vld [vmem:[%s768_s1 + $0x30] sm:$0xff] }
   0x5   :  { %496 = vmatprep.mubr.msk.f32.mxu0 %vm134_vm1, %v24_v3  ;;  %121 = vperm.xlu1 %557, %v51_v8   ;;  %v49_v13 = vld [vmem:[%s769_s2 + $0x58] sm:$0xff] }
   0x8   :  { %497 = vmatmul.mubr.msk.f32.gmra.mxu0 %vm134_vm1, %v25_v5  ;;  %126 = vperm.xlu0 %556, %v52_v9  }
   0x9   :  { %499 = vmatprep.mubr.msk.f32.mxu0 %vm134_vm1, %v26_v6  ;;  %116 = vperm.xlu1 %557, %v50_v11  }
   0xc   :  { %500 = vmatmul.mubr.msk.f32.gmra.mxu0 %vm134_vm1, %v27_v10 }
   0xd   :  { %10 = vsyncpa [#allocation3], 0  ;;  %502 = vmatprep.mubr.msk.f32.mxu0 %vm134_vm1, %v28_v12  ;;  %v29_v14 = vld [vmem:[%s768_s1 + $0x38] sm:$0xff]  ;;  %v48_v15 = vld [vmem:[%s769_s2 + $0x50] sm:$0xff]  ;;  %111 = vperm.xlu0 %556, %v49_v13   ;;  %v581_v35 = vmov 0.0   ;;  %vm582_vm2 = vmmov 0  }
   0xe   :  { %v30_v16 = vld [vmem:[%s768_s1 + $0x40] sm:$0xff]  ;;  %106 = vperm.xlu1 %557, %v48_v15   ;;  %v47_v17 = vld [vmem:[%s769_s2 + $0x48] sm:$0xff]  ;;  %v32_v20 = vld [vmem:[%s768_s1 + $0x50] sm:$0xff]  ;;  %517 = vmatprep.subr.mxu1 %v581_v35  ;;  %s583_s7 = smov [#allocation2]  }
   0xf   :  { %v31_v18 = vld [vmem:[%s768_s1 + $0x48] sm:$0xff]  ;;  %v46_v19 = vld [vmem:[%s769_s2 + $0x40] sm:$0xff]  ;;  %v45_v21 = vld [vmem:[%s769_s2 + $0x38] sm:$0xff]  ;;  %549 = vmatprep.mubr.msk.f32.mxu1 %vm582_vm2, %v581_v35  ;;  %s432_s8 = sshll.u32 %s583_s7, 4  ;;  %s433_s8 = int_to_ptr.vmem [resolvable:$true] %s432_s8 }
  0x10   :  { %503 = vmatmul.mubr.msk.f32.gmra.mxu0 %vm134_vm1, %v29_v14  ;;  %v33_v22 = vld [vmem:[%s768_s1 + $0x58] sm:$0xff]  ;;  %v44_v23 = vld [vmem:[%s769_s2 + $0x30] sm:$0xff]  ;;  %v34_v24 = vld [vmem:[%s768_s1 + $0x60] sm:$0xff]  ;;  %s558_s9 = scalar_lea.vmem %s433_s8, 32  ;;  %p563_p1 = scmp.lt.s32.totalorder %s433_s8, %s433_s8 }
  0x11   :  { %505 = vmatprep.mubr.msk.f32.mxu0 %vm134_vm1, %v30_v16  ;;  %101 = vperm.xlu0 %556, %v47_v17   ;;  %v43_v25 = vld [vmem:[%s769_s2 + $0x28] sm:$0xff]  ;;  %v42_v27 = vld [vmem:[%s769_s2 + $0x20] sm:$0xff]  ;;  %v36_v28 = vld [vmem:[%s768_s1 + $0x70] sm:$0xff]  ;;  %p559_p0 = scmp.ne.s32.totalorder %s433_s8, %s558_s9  ;;  %p564_p2 = scmp.lt.s32.totalorder %s558_s9, %s558_s9 }
  0x12   :  { %96 = vperm.xlu1 %557, %v46_v19   ;;  %v35_v26 = vld [vmem:[%s768_s1 + $0x68] sm:$0xff]  ;;  %v41_v29 = vld [vmem:[%s769_s2 + $0x18] sm:$0xff]  ;;  %v40_v31 = vld [vmem:[%s769_s2 + $0x10] sm:$0xff] }
  0x13   :  { %v37_v30 = vld [vmem:[%s768_s1 + $0x78] sm:$0xff]  ;;  %v39_v32 = vld [vmem:[%s769_s2 + $0x8] sm:$0xff]  ;;  %v38_v33 = vld [vmem:[%s769_s2] sm:$0xff]  ;;  %p565_p3 = por %p564_p2, %p563_p1 }
  0x14   :  { %506 = vmatmul.mubr.msk.f32.gmra.mxu0 %vm134_vm1, %v31_v18  ;;  %v349_v34 = vld [vmem:[%s771_s4] sm:$0x3] }
  0x15   :  { %508 = vmatprep.mubr.msk.f32.mxu0 %vm134_vm1, %v32_v20  ;;  %91 = vperm.xlu0 %556, %v45_v21   ;;  %p566_p4 = pnand %p565_p3, %p559_p0 }
  0x16   :  { %86 = vperm.xlu1 %557, %v44_v23  }
  0x18   :  { %509 = vmatmul.mubr.msk.f32.gmra.mxu0 %vm134_vm1, %v33_v22 }
  0x19   :  { %511 = vmatprep.mubr.msk.f32.mxu0 %vm134_vm1, %v34_v24  ;;  %81 = vperm.xlu0 %556, %v43_v25  }
  0x1a   :  { %76 = vperm.xlu1 %557, %v42_v27  }
  0x1c   :  { %512 = vmatmul.mubr.msk.f32.gmra.mxu0 %vm134_vm1, %v35_v26 }
  0x1d   :  { %514 = vmatprep.mubr.msk.f32.mxu0 %vm134_vm1, %v36_v28  ;;  %71 = vperm.xlu0 %556, %v41_v29  }
  0x1e   :  { %66 = vperm.xlu1 %557, %v40_v31  }
  0x20   :  { %515 = vmatmul.mubr.msk.f32.gmra.mxu0 %vm134_vm1, %v37_v30 }
  0x21   :  { %61 = vperm.xlu0 %556, %v39_v32  }
  0x22   :  { %56 = vperm.xlu1 %557, %v38_v33  }
  0x25   :  { %352 = vperm.xlu0 %556, %v349_v34  }
  0x7f   :  { %v132_v41 = vpop.permute.xlu0 %131 }
  0x80   :  { %v122_v43 = vpop.permute.xlu1 %121 }
  0x83   :  { %v127_v46 = vpop.permute.xlu0 %126 }
  0x84   :  { %v117_v48 = vpop.permute.xlu1 %116 }
  0x88   :  { %v112_v51 = vpop.permute.xlu0 %111 }
  0x89   :  { %v107_v53 = vpop.permute.xlu1 %106 }
  0x8c   :  { %v102_v56 = vpop.permute.xlu0 %101 }
  0x8d   :  { %v97_v59 = vpop.permute.xlu1 %96 }
  0x90   :  { %v92_v2 = vpop.permute.xlu0 %91 }
  0x91   :  { %v87_v5 = vpop.permute.xlu1 %86 }
  0x94   :  { %v82_v10 = vpop.permute.xlu0 %81 }
  0x95   :  { %v77_v13 = vpop.permute.xlu1 %76 }
  0x98   :  { %v72_v18 = vpop.permute.xlu0 %71 }
  0x99   :  { %v67_v21 = vpop.permute.xlu1 %66 }
  0x9c   :  { %v62_v26 = vpop.permute.xlu0 %61 }
  0x9d   :  { %v57_v29 = vpop.permute.xlu1 %56 }
  0xc4   :  { %v734_v36 = vpop.f32.mrf.mxu0 }
  0xc5   :  { %v259_v30 = vadd.f32 %v734_v36, %v62_v26  ;;  %v348_v36 = vld [vmem:[%s770_s3] sm:$0x3] }
  0xc6   :  { %v736_v37 = vpop.f32.mrf.mxu0 }
  0xc7   :  { %v254_v32 = vadd.f32 %v736_v37, %v57_v29  ;;  %v333_v34 = vmax.f32 %v259_v30, 0.0  ;;  %v353_v37 = vpop.permute.xlu0 %352 }
  0xc8   :  { %v738_v38 = vpop.f32.mrf.mxu0 }
  0xc9   :  { %v269_v24 = vadd.f32 %v738_v38, %v72_v18  ;;  %v332_v38 = vmax.f32 %v254_v32, 0.0 }
  0xca   :  { %v740_v39 = vpop.f32.mrf.mxu0 }
  0xcb   :  { %v264_v27 = vadd.f32 %v740_v39, %v67_v21  ;;  %v335_v31 = vmax.f32 %v269_v24, 0.0 }
  0xcc   :  { %v501_v40 = vpop.f32.mrf.mxu0 }
  0xcd   :  { %v279_v19 = vadd.f32 %v501_v40, %v82_v10  ;;  %v334_v33 = vmax.f32 %v264_v27, 0.0 }
  0xce   :  { %v273_v42 = vpop.f32.mrf.mxu0 }
  0xcf   :  { %v274_v22 = vadd.f32 %v273_v42, %v77_v13  ;;  %v337_v25 = vmax.f32 %v279_v19, 0.0 }
  0xd0   :  { %v504_v44 = vpop.f32.mrf.mxu0 }
  0xd1   :  { %v289_v14 = vadd.f32 %v504_v44, %v92_v2  ;;  %v336_v28 = vmax.f32 %v274_v22, 0.0 }
  0xd2   :  { %v283_v45 = vpop.f32.mrf.mxu0 }
  0xd3   :  { %v284_v16 = vadd.f32 %v283_v45, %v87_v5  ;;  %v339_v20 = vmax.f32 %v289_v14, 0.0 }
  0xd4   :  { %v507_v47 = vpop.f32.mrf.mxu0 }
  0xd5   :  { %v299_v8 = vadd.f32 %v507_v47, %v102_v56  ;;  %v338_v23 = vmax.f32 %v284_v16, 0.0 }
  0xd6   :  { %v293_v49 = vpop.f32.mrf.mxu0 }
  0xd7   :  { %v294_v11 = vadd.f32 %v293_v49, %v97_v59  ;;  %v341_v15 = vmax.f32 %v299_v8, 0.0 }
  0xd8   :  { %v510_v50 = vpop.f32.mrf.mxu0 }
  0xd9   :  { %v309_v3 = vadd.f32 %v510_v50, %v112_v51  ;;  %v340_v17 = vmax.f32 %v294_v11, 0.0 }
  0xda   :  { %v303_v52 = vpop.f32.mrf.mxu0 }
  0xdb   :  { %v304_v6 = vadd.f32 %v303_v52, %v107_v53  ;;  %v343_v9 = vmax.f32 %v309_v3, 0.0 }
  0xdc   :  { %v513_v54 = vpop.f32.mrf.mxu0 }
  0xdd   :  { %v319_v61 = vadd.f32 %v513_v54, %v122_v43  ;;  %v342_v12 = vmax.f32 %v304_v6, 0.0 }
  0xde   :  { %v313_v55 = vpop.f32.mrf.mxu0 }
  0xdf   :  { %v314_v0 = vadd.f32 %v313_v55, %v117_v48  ;;  %v345_v4 = vmax.f32 %v319_v61, 0.0 }
  0xe0   :  { %v516_v57 = vpop.f32.mrf.mxu0 }
  0xe1   :  { %v329_v58 = vadd.f32 %v516_v57, %v132_v41  ;;  %v344_v7 = vmax.f32 %v314_v0, 0.0 }
  0xe2   :  { %v323_v60 = vpop.f32.mrf.mxu0 }
  0xe3   :  { %v347_v62 = vmax.f32 %v329_v58, 0.0  ;;  %v324_v63 = vadd.f32 %v323_v60, %v127_v46 }
  0xe5   :  { %v346_v1 = vmax.f32 %v324_v63, 0.0  ;;  %518 = vmatpush3.msra.mxu1 %v347_v62 }
  0xe6   :  { %519 = vmatprep.subr.mxu1 %v581_v35 }
  0xe7   :  { %520 = vmatpush3.msra.mxu1 %v346_v1 }
  0xe8   :  { %521 = vmatprep.subr.mxu1 %v581_v35 }
  0xe9   :  { %522 = vmatpush3.msra.mxu1 %v345_v4 }
  0xea   :  { %523 = vmatprep.subr.mxu1 %v581_v35 }
  0xeb   :  { %524 = vmatpush3.msra.mxu1 %v344_v7 }
  0xec   :  { %525 = vmatprep.subr.mxu1 %v581_v35 }
  0xed   :  { %526 = vmatpush3.msra.mxu1 %v343_v9 }
  0xee   :  { %527 = vmatprep.subr.mxu1 %v581_v35 }
  0xef   :  { %528 = vmatpush3.msra.mxu1 %v342_v12 }
  0xf0   :  { %529 = vmatprep.subr.mxu1 %v581_v35 }
  0xf1   :  { %530 = vmatpush3.msra.mxu1 %v341_v15 }
  0xf2   :  { %531 = vmatprep.subr.mxu1 %v581_v35 }
  0xf3   :  { %532 = vmatpush3.msra.mxu1 %v340_v17 }
  0xf4   :  { %533 = vmatprep.subr.mxu1 %v581_v35 }
  0xf5   :  { %534 = vmatpush3.msra.mxu1 %v339_v20 }
  0xf6   :  { %535 = vmatprep.subr.mxu1 %v581_v35 }
  0xf7   :  { %536 = vmatpush3.msra.mxu1 %v338_v23 }
  0xf8   :  { %537 = vmatprep.subr.mxu1 %v581_v35 }
  0xf9   :  { %538 = vmatpush3.msra.mxu1 %v337_v25 }
  0xfa   :  { %539 = vmatprep.subr.mxu1 %v581_v35 }
  0xfb   :  { %540 = vmatpush3.msra.mxu1 %v336_v28 }
  0xfc   :  { %541 = vmatprep.subr.mxu1 %v581_v35 }
  0xfd   :  { %542 = vmatpush3.msra.mxu1 %v335_v31 }
  0xfe   :  { %543 = vmatprep.subr.mxu1 %v581_v35 }
  0xff   :  { %544 = vmatpush3.msra.mxu1 %v334_v33 }
 0x100   :  { %545 = vmatprep.subr.mxu1 %v581_v35 }
 0x101   :  { %546 = vmatpush3.msra.mxu1 %v333_v34 }
 0x102   :  { %547 = vmatprep.subr.mxu1 %v581_v35 }
 0x103   :  { %548 = vmatpush3.msra.mxu1 %v332_v38 }
 0x104   :  { %550 = vmatmul.mubr.f32.vlgmr.msra.gmra.mxu1 %v348_v36 }
 0x1c4   :  { %v421_v39 = vpop.f32.mrf.mxu1 }
 0x1c5   :  { %v422_v40 = vadd.f32 %v421_v39, %v353_v37 }
 0x1c6   :  { %v551_v41 = vpop.f32.mrf.mxu1 }
 0x1c7   :  { %425 = vst [vmem:[#allocation2] sm:$0x3] %v422_v40 }
 0x1c8   :  { %569 = shalt.err (!%p566_p4)
}
 0x1c9   :  { %435 = dma.vmem_to_hbm [thread:$0]  %s433_s8, 32, %s772_s5, [#allocation3]  }
 0x1ca   :  { %578 = dma.done.wait [#allocation3], 32  }
 0x1cb   :  { %579 = vsyncadd [#allocation3], 4294967264 }
 0x1cc   :  { %439 = vsyncpa [#allocation3], 1 }

</bundles_post_ra>
